<compile_context>
chip_gen: v7x
topology: tpu7x:2x2x1
jax: 0.10.0
libtpu: 0.0.40
codegen_flags: <defaults>
</compile_context>

<pallas_src>
import functools

import jax
import jax.numpy as jnp
from jax import lax
from jax.experimental import pallas as pl
from jax.experimental.pallas import tpu as pltpu


def _round_up(x, m):
    return (x + m - 1) // m * m


def _lstm_chunk_kernel(x_ref, h0_ref, c0_ref, wih_ref, whh_ref,
                       y_ref, hN_ref, cN_ref, xproj_ref,
                       *, T, Tc, Bp, H, unroll, needs_mask):
    """One time-chunk of the LSTM recurrence.

    x_ref    : (Tc*Bp, E+1) time-major, batch-padded inputs (+ ones column)
    h0_ref   : (Bp, H)      initial hidden state (resident; read at chunk 0)
    c0_ref   : (Bp, H)      initial cell state
    wih_ref  : (E+1, Gp)    packed-gate input weights, bias folded as last row
    whh_ref  : (H, Gp)      packed-gate recurrent weights (W_hh^T)
    y_ref    : (Tc, Bp, H)  this chunk's outputs
    hN_ref   : (Bp, H)      resident carry / final hidden state
    cN_ref   : (Bp, H)      resident carry / final cell state
    xproj_ref: (Tc*Bp, Gp)  VMEM scratch for the per-chunk input projection
    """
    chunk = pl.program_id(0)

    # Seed the carry. hN/cN blocks have a constant index_map, so they stay
    # resident in VMEM across the whole time-chunk grid (accumulator pattern)
    # and are written back to HBM exactly once at the end.
    @pl.when(chunk == 0)
    def _():
        hN_ref[...] = h0_ref[...]
        cN_ref[...] = c0_ref[...]

    # Hoisted, non-recurrent input projection for the whole chunk; the bias is
    # folded in via the ones column of x. One MXU matmul off the serial path.
    xproj_ref[...] = jnp.dot(x_ref[...], wih_ref[...],
                             preferred_element_type=jnp.float32)

    def step(t, carry):
        h_prev, c_prev = carry                                # (Bp, H) each
        off = pl.multiple_of(t * Bp, Bp)                      # aligned vld
        gx = xproj_ref[pl.ds(off, Bp), :]                     # (Bp, Gp)
        # Re-index whh_ref inside the dot each step (it lives in VMEM); do NOT
        # pin a large live value across the unrolled loop.
        gates = gx + jnp.dot(h_prev, whh_ref[...],
                             preferred_element_type=jnp.float32)
        # All four gates share one packed lane stripe: one sigmoid sweep + one
        # tanh sweep, then cheap lane selects per gate range.
        sig = jax.nn.sigmoid(gates)
        th = jnp.tanh(gates)
        i_g = sig[:, 0 * H:1 * H]
        f_g = sig[:, 1 * H:2 * H]
        g_g = th[:, 2 * H:3 * H]
        o_g = sig[:, 3 * H:4 * H]
        c_t = f_g * c_prev + i_g * g_g
        h_t = o_g * jnp.tanh(c_t)
        if needs_mask:
            # Only emitted when T was padded up to a multiple of Tc: steps past
            # the true sequence length leave the carry untouched.
            valid = (chunk * Tc + t) < T
            h_t = jnp.where(valid, h_t, h_prev)
            c_t = jnp.where(valid, c_t, c_prev)
        y_ref[t] = h_t
        return h_t, c_t

    h_n, c_n = lax.fori_loop(0, Tc, step, (hN_ref[...], cN_ref[...]),
                             unroll=unroll)
    hN_ref[...] = h_n
    cN_ref[...] = c_n


def _vmem_limit_bytes(Tc, Bp, E1, H, Gp):
    def tile(r, c):
        return _round_up(r, 8) * _round_up(c, 128) * 4

    need = (2 * tile(Tc * Bp, E1)          # double-buffered x chunk
            + 2 * Tc * tile(Bp, H)         # double-buffered y chunk
            + tile(Tc * Bp, Gp)            # xproj scratch
            + 2 * (tile(E1, Gp) + tile(H, Gp))   # weights
            + 8 * tile(Bp, H))             # h0/c0/hN/cN
    return int(min(max(need + (4 << 20), 32 << 20), 64 << 20))


def lstm_pallas(x_flat, h0p, c0p, wih_p, whh_p, *, T, Tp, Tc, Bp, H, Gp):
    nC = Tp // Tc
    E1 = x_flat.shape[-1]
    unroll = Tc if Tc <= 8 else 8
    kernel = functools.partial(_lstm_chunk_kernel, T=T, Tc=Tc, Bp=Bp, H=H,
                               unroll=unroll, needs_mask=(Tp != T))

    grid_spec = pltpu.PrefetchScalarGridSpec(
        num_scalar_prefetch=0,
        grid=(nC,),
        in_specs=[
            pl.BlockSpec((Tc * Bp, E1), lambda c: (c, 0)),   # x chunk
            pl.BlockSpec((Bp, H), lambda c: (0, 0)),         # h0 (resident)
            pl.BlockSpec((Bp, H), lambda c: (0, 0)),         # c0 (resident)
            pl.BlockSpec((E1, Gp), lambda c: (0, 0)),        # W_ih^T + bias row
            pl.BlockSpec((H, Gp), lambda c: (0, 0)),         # W_hh^T
        ],
        out_specs=(
            pl.BlockSpec((Tc, Bp, H), lambda c: (c, 0, 0)),  # y chunk
            pl.BlockSpec((Bp, H), lambda c: (0, 0)),         # h_n (resident)
            pl.BlockSpec((Bp, H), lambda c: (0, 0)),         # c_n (resident)
        ),
        scratch_shapes=[pltpu.VMEM((Tc * Bp, Gp), jnp.float32)],
    )

    y_tm, h_n, c_n = pl.pallas_call(
        kernel,
        grid_spec=grid_spec,
        out_shape=(
            jax.ShapeDtypeStruct((Tp, Bp, H), jnp.float32),
            jax.ShapeDtypeStruct((Bp, H), jnp.float32),
            jax.ShapeDtypeStruct((Bp, H), jnp.float32),
        ),
        compiler_params=pltpu.CompilerParams(
            dimension_semantics=("arbitrary",),              # serial recurrence
            vmem_limit_bytes=_vmem_limit_bytes(Tc, Bp, E1, H, Gp)),
    )(x_flat, h0p, c0p, wih_p, whh_p)
    return y_tm, h_n, c_n


def dncoder_forward(params, x_ids, h0, c0, *, proj_dtype=jnp.float32):
    """Matches Dncoder.forward(x, h0, c0).
    x_ids: (B, T) int32; h0, c0: (1, B, H).
    Returns y (B, T, H), h_n (1, B, H), c_n (1, B, H).
    proj_dtype=jnp.bfloat16 is recommended on v6e/v7x for the hoisted input
    projection (halves VMEM/vld traffic, uses the bf16 MXU path); default is
    float32 to keep tight numerical agreement with the reference."""
    emb = params["embedding"]
    x_emb = jnp.take(emb, x_ids, axis=0)            # (B, T, E)  gather glue
    B, T, E = x_emb.shape
    H = h0.shape[-1]
    Bp = _round_up(max(B, 8), 8)                    # sublane-width batch pad
    G = 4 * H
    Gp = _round_up(G, 128)                          # packed-gate lane width
    Tc = min(T, 128)                                # timesteps per chunk
    nC = -(-T // Tc)
    Tp = nC * Tc

    # Time-major, append ones column (folds bias into the projection matmul),
    # pad batch -> Bp and time -> Tp, flatten to (Tp*Bp, E+1).
    x_tm = jnp.transpose(x_emb, (1, 0, 2)).astype(proj_dtype)        # (T,B,E)
    x_tm = jnp.concatenate(
        [x_tm, jnp.ones((T, B, 1), proj_dtype)], axis=-1)            # (T,B,E+1)
    x_tm = jnp.pad(x_tm, ((0, Tp - T), (0, Bp - B), (0, 0)))
    x_flat = x_tm.reshape(Tp * Bp, E + 1)

    # Packed-gate weights: gate k (PyTorch order i,f,g,o) occupies columns
    # [k*H, (k+1)*H); bias (b_ih + b_hh) folded in as the last W_ih row.
    bias = (params["b_ih"] + params["b_hh"])[None, :]                # (1, 4H)
    wih_aug = jnp.concatenate([params["w_ih"].T, bias], axis=0)      # (E+1,4H)
    wih_p = jnp.pad(wih_aug, ((0, 0), (0, Gp - G))).astype(proj_dtype)
    whh_p = jnp.pad(params["w_hh"].T,
                    ((0, 0), (0, Gp - G))).astype(jnp.float32)       # (H, Gp)

    h0p = jnp.pad(h0[0], ((0, Bp - B), (0, 0))).astype(jnp.float32)  # (Bp, H)
    c0p = jnp.pad(c0[0], ((0, Bp - B), (0, 0))).astype(jnp.float32)

    y_tm, h_n, c_n = lstm_pallas(x_flat, h0p, c0p, wih_p, whh_p,
                                 T=T, Tp=Tp, Tc=Tc, Bp=Bp, H=H, Gp=Gp)

    y = jnp.transpose(y_tm, (1, 0, 2))[:B, :T, :]   # back to batch_first
    return y, h_n[None, :B, :], c_n[None, :B, :]


def _reference_forward(params, x_ids, h0, c0):
    """Pure-JAX reference (PyTorch LSTM semantics) for correctness check."""
    emb = params["embedding"]
    x_emb = jnp.take(emb, x_ids, axis=0)            # (B, T, E)
    H = h0.shape[-1]
    w_ih, w_hh = params["w_ih"], params["w_hh"]
    b = params["b_ih"] + params["b_hh"]

    def step(carry, x_t):
        h, c = carry
        gates = x_t @ w_ih.T + h @ w_hh.T + b
        i = jax.nn.sigmoid(gates[:, 0 * H:1 * H])
        f = jax.nn.sigmoid(gates[:, 1 * H:2 * H])
        g = jnp.tanh(gates[:, 2 * H:3 * H])
        o = jax.nn.sigmoid(gates[:, 3 * H:4 * H])
        c_new = f * c + i * g
        h_new = o * jnp.tanh(c_new)
        return (h_new, c_new), h_new

    (h_n, c_n), ys = lax.scan(step, (h0[0], c0[0]),
                              jnp.transpose(x_emb, (1, 0, 2)))
    return jnp.transpose(ys, (1, 0, 2)), h_n[None], c_n[None]


def init_params(key, embedding_dim, hidden_num, ch_len):
    k1, k2, k3, k4, k5 = jax.random.split(key, 5)
    s = 1.0 / jnp.sqrt(hidden_num)
    return {
        "embedding": jax.random.normal(k1, (ch_len, embedding_dim), jnp.float32),
        "w_ih": jax.random.uniform(k2, (4 * hidden_num, embedding_dim),
                                   jnp.float32, -s, s),
        "w_hh": jax.random.uniform(k3, (4 * hidden_num, hidden_num),
                                   jnp.float32, -s, s),
        "b_ih": jax.random.uniform(k4, (4 * hidden_num,), jnp.float32, -s, s),
        "b_hh": jax.random.uniform(k5, (4 * hidden_num,), jnp.float32, -s, s),
    }


if __name__ == "__main__":
    B, T = 2, 8
    embedding_dim, hidden_num, ch_len = 16, 32, 50

    key = jax.random.PRNGKey(0)
    kp, kx, kh, kc = jax.random.split(key, 4)
    params = init_params(kp, embedding_dim, hidden_num, ch_len)

    x_ids = jax.random.randint(kx, (B, T), 0, ch_len, dtype=jnp.int32)
    h0 = jax.random.normal(kh, (1, B, hidden_num), jnp.float32)
    c0 = jax.random.normal(kc, (1, B, hidden_num), jnp.float32)

    y, h_n, c_n = jax.block_until_ready(
        jax.jit(dncoder_forward)(params, x_ids, h0, c0))

    y_ref, h_ref, c_ref = _reference_forward(params, x_ids, h0, c0)
    assert y.shape == (B, T, hidden_num)
    assert h_n.shape == (1, B, hidden_num) and c_n.shape == (1, B, hidden_num)
    assert jnp.allclose(y, y_ref, atol=1e-4, rtol=1e-4)
    assert jnp.allclose(h_n, h_ref, atol=1e-4, rtol=1e-4)
    assert jnp.allclose(c_n, c_ref, atol=1e-4, rtol=1e-4)

    print("KERNEL_OK")
</pallas_src>

<mosaic_0001>
module attributes {stable_mosaic.version = 11 : i64} {
  func.func @_lstm_chunk_kernel(%arg0: i32, %arg1: memref<64x17xf32, #tpu.memory_space<vmem>>, %arg2: memref<8x32xf32, #tpu.memory_space<vmem>>, %arg3: memref<8x32xf32, #tpu.memory_space<vmem>>, %arg4: memref<17x128xf32, #tpu.memory_space<vmem>>, %arg5: memref<32x128xf32, #tpu.memory_space<vmem>>, %arg6: memref<8x8x32xf32, #tpu.memory_space<vmem>>, %arg7: memref<8x32xf32, #tpu.memory_space<vmem>>, %arg8: memref<8x32xf32, #tpu.memory_space<vmem>>, %arg9: memref<64x128xf32, #tpu.memory_space<vmem>>) attributes {dimension_semantics = [#tpu.dimension_semantics<arbitrary>], iteration_bounds = array<i64: 1>, scalar_prefetch = 0 : i64, scratch_operands = 1 : i64, tpu.core_type = #tpu.core_type<tc>, window_params = [{transform_indices = @transform_0, window_bounds = array<i64: 64, 17>}, {pipeline_mode = #tpu.pipeline_mode<synchronous>, transform_indices = @transform_1, window_bounds = array<i64: 8, 32>}, {pipeline_mode = #tpu.pipeline_mode<synchronous>, transform_indices = @transform_2, window_bounds = array<i64: 8, 32>}, {pipeline_mode = #tpu.pipeline_mode<synchronous>, transform_indices = @transform_3, window_bounds = array<i64: 17, 128>}, {pipeline_mode = #tpu.pipeline_mode<synchronous>, transform_indices = @transform_4, window_bounds = array<i64: 32, 128>}, {transform_indices = @transform_5, window_bounds = array<i64: 8, 8, 32>}, {pipeline_mode = #tpu.pipeline_mode<synchronous>, transform_indices = @transform_6, window_bounds = array<i64: 8, 32>}, {pipeline_mode = #tpu.pipeline_mode<synchronous>, transform_indices = @transform_7, window_bounds = array<i64: 8, 32>}]} {
    %c0_i32 = arith.constant 0 : i32
    %0 = arith.cmpi eq, %arg0, %c0_i32 : i32
    %1 = arith.extui %0 : i1 to i32
    %c0_i32_0 = arith.constant 0 : i32
    %2 = arith.cmpi ne, %1, %c0_i32_0 : i32
    scf.if %2 {
      %c0_79 = arith.constant 0 : index
      %c0_80 = arith.constant 0 : index
      %219 = vector.load %arg2[%c0_79, %c0_80] : memref<8x32xf32, #tpu.memory_space<vmem>>, vector<8x32xf32>
      %c0_81 = arith.constant 0 : index
      %c0_82 = arith.constant 0 : index
      %220 = vector.load %arg7[%c0_81, %c0_82] : memref<8x32xf32, #tpu.memory_space<vmem>>, vector<8x32xf32>
      tpu.vector_store %arg7[%c0_81, %c0_82], %219 {strides = array<i32>} : memref<8x32xf32, #tpu.memory_space<vmem>>, vector<8x32xf32>,
      %c0_83 = arith.constant 0 : index
      %c0_84 = arith.constant 0 : index
      %221 = vector.load %arg3[%c0_83, %c0_84] : memref<8x32xf32, #tpu.memory_space<vmem>>, vector<8x32xf32>
      %c0_85 = arith.constant 0 : index
      %c0_86 = arith.constant 0 : index
      %222 = vector.load %arg8[%c0_85, %c0_86] : memref<8x32xf32, #tpu.memory_space<vmem>>, vector<8x32xf32>
      tpu.vector_store %arg8[%c0_85, %c0_86], %221 {strides = array<i32>} : memref<8x32xf32, #tpu.memory_space<vmem>>, vector<8x32xf32>,
    } else {
    }
    %c0 = arith.constant 0 : index
    %c0_1 = arith.constant 0 : index
    %3 = vector.load %arg1[%c0, %c0_1] : memref<64x17xf32, #tpu.memory_space<vmem>>, vector<64x17xf32>
    %c0_2 = arith.constant 0 : index
    %c0_3 = arith.constant 0 : index
    %4 = vector.load %arg4[%c0_2, %c0_3] : memref<17x128xf32, #tpu.memory_space<vmem>>, vector<17x128xf32>
    %cst = arith.constant dense<0.000000e+00> : vector<64x128xf32>
    %5 = tpu.matmul %3, %4, %cst {dimension_numbers = #tpu.dot_dimension_numbers<[1], [0], [0], [1], [0, 0, 1, 1], [], []>} : vector<64x17xf32>, vector<17x128xf32>, vector<64x128xf32> -> vector<64x128xf32>
    %c0_4 = arith.constant 0 : index
    %c0_5 = arith.constant 0 : index
    %6 = vector.load %arg9[%c0_4, %c0_5] : memref<64x128xf32, #tpu.memory_space<vmem>>, vector<64x128xf32>
    tpu.vector_store %arg9[%c0_4, %c0_5], %5 {strides = array<i32>} : memref<64x128xf32, #tpu.memory_space<vmem>>, vector<64x128xf32>,
    %c0_6 = arith.constant 0 : index
    %c0_7 = arith.constant 0 : index
    %7 = vector.load %arg7[%c0_6, %c0_7] : memref<8x32xf32, #tpu.memory_space<vmem>>, vector<8x32xf32>
    %c0_8 = arith.constant 0 : index
    %c0_9 = arith.constant 0 : index
    %8 = vector.load %arg8[%c0_8, %c0_9] : memref<8x32xf32, #tpu.memory_space<vmem>>, vector<8x32xf32>
    %c0_i32_10 = arith.constant 0 : i32
    %c8_i32 = arith.constant 8 : i32
    %9 = arith.muli %c0_i32_10, %c8_i32 : i32
    %10 = tpu.assume_multiple %9, 8 : i32
    %11 = arith.index_cast %10 : i32 to index
    %c0_11 = arith.constant 0 : index
    %12 = vector.load %arg9[%11, %c0_11] : memref<64x128xf32, #tpu.memory_space<vmem>>, vector<8x128xf32>
    %c0_12 = arith.constant 0 : index
    %c0_13 = arith.constant 0 : index
    %13 = vector.load %arg5[%c0_12, %c0_13] : memref<32x128xf32, #tpu.memory_space<vmem>>, vector<32x128xf32>
    %cst_14 = arith.constant dense<0.000000e+00> : vector<8x128xf32>
    %14 = tpu.matmul %7, %13, %cst_14 {dimension_numbers = #tpu.dot_dimension_numbers<[1], [0], [0], [1], [0, 0, 1, 1], [], []>} : vector<8x32xf32>, vector<32x128xf32>, vector<8x128xf32> -> vector<8x128xf32>
    %15 = arith.addf %12, %14 : vector<8x128xf32>
    %16 = arith.negf %15 : vector<8x128xf32>
    %17 = math.exp %16 : vector<8x128xf32>
    %cst_15 = arith.constant 1.000000e+00 : f32
    %18 = vector.broadcast %cst_15 : f32 to vector<8x128xf32>
    %19 = arith.addf %18, %17 : vector<8x128xf32>
    %20 = arith.divf %18, %19 : vector<8x128xf32>
    %21 = math.tanh %15 : vector<8x128xf32>
    %22 = vector.extract_strided_slice %20 {offsets = [0, 0], sizes = [8, 32], strides = [1, 1]} : vector<8x128xf32> to vector<8x32xf32>
    %23 = vector.extract_strided_slice %20 {offsets = [0, 32], sizes = [8, 32], strides = [1, 1]} : vector<8x128xf32> to vector<8x32xf32>
    %24 = vector.extract_strided_slice %21 {offsets = [0, 64], sizes = [8, 32], strides = [1, 1]} : vector<8x128xf32> to vector<8x32xf32>
    %25 = vector.extract_strided_slice %20 {offsets = [0, 96], sizes = [8, 32], strides = [1, 1]} : vector<8x128xf32> to vector<8x32xf32>
    %26 = arith.mulf %23, %8 : vector<8x32xf32>
    %27 = arith.mulf %22, %24 : vector<8x32xf32>
    %28 = arith.addf %26, %27 : vector<8x32xf32>
    %29 = math.tanh %28 : vector<8x32xf32>
    %30 = arith.mulf %25, %29 : vector<8x32xf32>
    %31 = arith.index_cast %c0_i32_10 : i32 to index
    %c0_16 = arith.constant 0 : index
    %c0_17 = arith.constant 0 : index
    %32 = vector.load %arg6[%31, %c0_16, %c0_17] : memref<8x8x32xf32, #tpu.memory_space<vmem>>, vector<1x8x32xf32>
    %33 = vector.shape_cast %32 : vector<1x8x32xf32> to vector<8x32xf32>
    %34 = vector.shape_cast %30 : vector<8x32xf32> to vector<1x8x32xf32>
    tpu.vector_store %arg6[%31, %c0_16, %c0_17], %34 {strides = array<i32>} : memref<8x8x32xf32, #tpu.memory_space<vmem>>, vector<1x8x32xf32>,
    %c1_i32 = arith.constant 1 : i32
    %c8_i32_18 = arith.constant 8 : i32
    %35 = arith.muli %c1_i32, %c8_i32_18 : i32
    %36 = tpu.assume_multiple %35, 8 : i32
    %37 = arith.index_cast %36 : i32 to index
    %c0_19 = arith.constant 0 : index
    %38 = vector.load %arg9[%37, %c0_19] : memref<64x128xf32, #tpu.memory_space<vmem>>, vector<8x128xf32>
    %c0_20 = arith.constant 0 : index
    %c0_21 = arith.constant 0 : index
    %39 = vector.load %arg5[%c0_20, %c0_21] : memref<32x128xf32, #tpu.memory_space<vmem>>, vector<32x128xf32>
    %cst_22 = arith.constant dense<0.000000e+00> : vector<8x128xf32>
    %40 = tpu.matmul %30, %39, %cst_22 {dimension_numbers = #tpu.dot_dimension_numbers<[1], [0], [0], [1], [0, 0, 1, 1], [], []>} : vector<8x32xf32>, vector<32x128xf32>, vector<8x128xf32> -> vector<8x128xf32>
    %41 = arith.addf %38, %40 : vector<8x128xf32>
    %42 = arith.negf %41 : vector<8x128xf32>
    %43 = math.exp %42 : vector<8x128xf32>
    %cst_23 = arith.constant 1.000000e+00 : f32
    %44 = vector.broadcast %cst_23 : f32 to vector<8x128xf32>
    %45 = arith.addf %44, %43 : vector<8x128xf32>
    %46 = arith.divf %44, %45 : vector<8x128xf32>
    %47 = math.tanh %41 : vector<8x128xf32>
    %48 = vector.extract_strided_slice %46 {offsets = [0, 0], sizes = [8, 32], strides = [1, 1]} : vector<8x128xf32> to vector<8x32xf32>
    %49 = vector.extract_strided_slice %46 {offsets = [0, 32], sizes = [8, 32], strides = [1, 1]} : vector<8x128xf32> to vector<8x32xf32>
    %50 = vector.extract_strided_slice %47 {offsets = [0, 64], sizes = [8, 32], strides = [1, 1]} : vector<8x128xf32> to vector<8x32xf32>
    %51 = vector.extract_strided_slice %46 {offsets = [0, 96], sizes = [8, 32], strides = [1, 1]} : vector<8x128xf32> to vector<8x32xf32>
    %52 = arith.mulf %49, %28 : vector<8x32xf32>
    %53 = arith.mulf %48, %50 : vector<8x32xf32>
    %54 = arith.addf %52, %53 : vector<8x32xf32>
    %55 = math.tanh %54 : vector<8x32xf32>
    %56 = arith.mulf %51, %55 : vector<8x32xf32>
    %57 = arith.index_cast %c1_i32 : i32 to index
    %c0_24 = arith.constant 0 : index
    %c0_25 = arith.constant 0 : index
    %58 = vector.load %arg6[%57, %c0_24, %c0_25] : memref<8x8x32xf32, #tpu.memory_space<vmem>>, vector<1x8x32xf32>
    %59 = vector.shape_cast %58 : vector<1x8x32xf32> to vector<8x32xf32>
    %60 = vector.shape_cast %56 : vector<8x32xf32> to vector<1x8x32xf32>
    tpu.vector_store %arg6[%57, %c0_24, %c0_25], %60 {strides = array<i32>} : memref<8x8x32xf32, #tpu.memory_space<vmem>>, vector<1x8x32xf32>,
    %c2_i32 = arith.constant 2 : i32
    %c8_i32_26 = arith.constant 8 : i32
    %61 = arith.muli %c2_i32, %c8_i32_26 : i32
    %62 = tpu.assume_multiple %61, 8 : i32
    %63 = arith.index_cast %62 : i32 to index
    %c0_27 = arith.constant 0 : index
    %64 = vector.load %arg9[%63, %c0_27] : memref<64x128xf32, #tpu.memory_space<vmem>>, vector<8x128xf32>
    %c0_28 = arith.constant 0 : index
    %c0_29 = arith.constant 0 : index
    %65 = vector.load %arg5[%c0_28, %c0_29] : memref<32x128xf32, #tpu.memory_space<vmem>>, vector<32x128xf32>
    %cst_30 = arith.constant dense<0.000000e+00> : vector<8x128xf32>
    %66 = tpu.matmul %56, %65, %cst_30 {dimension_numbers = #tpu.dot_dimension_numbers<[1], [0], [0], [1], [0, 0, 1, 1], [], []>} : vector<8x32xf32>, vector<32x128xf32>, vector<8x128xf32> -> vector<8x128xf32>
    %67 = arith.addf %64, %66 : vector<8x128xf32>
    %68 = arith.negf %67 : vector<8x128xf32>
    %69 = math.exp %68 : vector<8x128xf32>
    %cst_31 = arith.constant 1.000000e+00 : f32
    %70 = vector.broadcast %cst_31 : f32 to vector<8x128xf32>
    %71 = arith.addf %70, %69 : vector<8x128xf32>
    %72 = arith.divf %70, %71 : vector<8x128xf32>
    %73 = math.tanh %67 : vector<8x128xf32>
    %74 = vector.extract_strided_slice %72 {offsets = [0, 0], sizes = [8, 32], strides = [1, 1]} : vector<8x128xf32> to vector<8x32xf32>
    %75 = vector.extract_strided_slice %72 {offsets = [0, 32], sizes = [8, 32], strides = [1, 1]} : vector<8x128xf32> to vector<8x32xf32>
    %76 = vector.extract_strided_slice %73 {offsets = [0, 64], sizes = [8, 32], strides = [1, 1]} : vector<8x128xf32> to vector<8x32xf32>
    %77 = vector.extract_strided_slice %72 {offsets = [0, 96], sizes = [8, 32], strides = [1, 1]} : vector<8x128xf32> to vector<8x32xf32>
    %78 = arith.mulf %75, %54 : vector<8x32xf32>
    %79 = arith.mulf %74, %76 : vector<8x32xf32>
    %80 = arith.addf %78, %79 : vector<8x32xf32>
    %81 = math.tanh %80 : vector<8x32xf32>
    %82 = arith.mulf %77, %81 : vector<8x32xf32>
    %83 = arith.index_cast %c2_i32 : i32 to index
    %c0_32 = arith.constant 0 : index
    %c0_33 = arith.constant 0 : index
    %84 = vector.load %arg6[%83, %c0_32, %c0_33] : memref<8x8x32xf32, #tpu.memory_space<vmem>>, vector<1x8x32xf32>
    %85 = vector.shape_cast %84 : vector<1x8x32xf32> to vector<8x32xf32>
    %86 = vector.shape_cast %82 : vector<8x32xf32> to vector<1x8x32xf32>
    tpu.vector_store %arg6[%83, %c0_32, %c0_33], %86 {strides = array<i32>} : memref<8x8x32xf32, #tpu.memory_space<vmem>>, vector<1x8x32xf32>,
    %c3_i32 = arith.constant 3 : i32
    %c8_i32_34 = arith.constant 8 : i32
    %87 = arith.muli %c3_i32, %c8_i32_34 : i32
    %88 = tpu.assume_multiple %87, 8 : i32
    %89 = arith.index_cast %88 : i32 to index
    %c0_35 = arith.constant 0 : index
    %90 = vector.load %arg9[%89, %c0_35] : memref<64x128xf32, #tpu.memory_space<vmem>>, vector<8x128xf32>
    %c0_36 = arith.constant 0 : index
    %c0_37 = arith.constant 0 : index
    %91 = vector.load %arg5[%c0_36, %c0_37] : memref<32x128xf32, #tpu.memory_space<vmem>>, vector<32x128xf32>
    %cst_38 = arith.constant dense<0.000000e+00> : vector<8x128xf32>
    %92 = tpu.matmul %82, %91, %cst_38 {dimension_numbers = #tpu.dot_dimension_numbers<[1], [0], [0], [1], [0, 0, 1, 1], [], []>} : vector<8x32xf32>, vector<32x128xf32>, vector<8x128xf32> -> vector<8x128xf32>
    %93 = arith.addf %90, %92 : vector<8x128xf32>
    %94 = arith.negf %93 : vector<8x128xf32>
    %95 = math.exp %94 : vector<8x128xf32>
    %cst_39 = arith.constant 1.000000e+00 : f32
    %96 = vector.broadcast %cst_39 : f32 to vector<8x128xf32>
    %97 = arith.addf %96, %95 : vector<8x128xf32>
    %98 = arith.divf %96, %97 : vector<8x128xf32>
    %99 = math.tanh %93 : vector<8x128xf32>
    %100 = vector.extract_strided_slice %98 {offsets = [0, 0], sizes = [8, 32], strides = [1, 1]} : vector<8x128xf32> to vector<8x32xf32>
    %101 = vector.extract_strided_slice %98 {offsets = [0, 32], sizes = [8, 32], strides = [1, 1]} : vector<8x128xf32> to vector<8x32xf32>
    %102 = vector.extract_strided_slice %99 {offsets = [0, 64], sizes = [8, 32], strides = [1, 1]} : vector<8x128xf32> to vector<8x32xf32>
    %103 = vector.extract_strided_slice %98 {offsets = [0, 96], sizes = [8, 32], strides = [1, 1]} : vector<8x128xf32> to vector<8x32xf32>
    %104 = arith.mulf %101, %80 : vector<8x32xf32>
    %105 = arith.mulf %100, %102 : vector<8x32xf32>
    %106 = arith.addf %104, %105 : vector<8x32xf32>
    %107 = math.tanh %106 : vector<8x32xf32>
    %108 = arith.mulf %103, %107 : vector<8x32xf32>
    %109 = arith.index_cast %c3_i32 : i32 to index
    %c0_40 = arith.constant 0 : index
    %c0_41 = arith.constant 0 : index
    %110 = vector.load %arg6[%109, %c0_40, %c0_41] : memref<8x8x32xf32, #tpu.memory_space<vmem>>, vector<1x8x32xf32>
    %111 = vector.shape_cast %110 : vector<1x8x32xf32> to vector<8x32xf32>
    %112 = vector.shape_cast %108 : vector<8x32xf32> to vector<1x8x32xf32>
    tpu.vector_store %arg6[%109, %c0_40, %c0_41], %112 {strides = array<i32>} : memref<8x8x32xf32, #tpu.memory_space<vmem>>, vector<1x8x32xf32>,
    %c4_i32 = arith.constant 4 : i32
    %c8_i32_42 = arith.constant 8 : i32
    %113 = arith.muli %c4_i32, %c8_i32_42 : i32
    %114 = tpu.assume_multiple %113, 8 : i32
    %115 = arith.index_cast %114 : i32 to index
    %c0_43 = arith.constant 0 : index
    %116 = vector.load %arg9[%115, %c0_43] : memref<64x128xf32, #tpu.memory_space<vmem>>, vector<8x128xf32>
    %c0_44 = arith.constant 0 : index
    %c0_45 = arith.constant 0 : index
    %117 = vector.load %arg5[%c0_44, %c0_45] : memref<32x128xf32, #tpu.memory_space<vmem>>, vector<32x128xf32>
    %cst_46 = arith.constant dense<0.000000e+00> : vector<8x128xf32>
    %118 = tpu.matmul %108, %117, %cst_46 {dimension_numbers = #tpu.dot_dimension_numbers<[1], [0], [0], [1], [0, 0, 1, 1], [], []>} : vector<8x32xf32>, vector<32x128xf32>, vector<8x128xf32> -> vector<8x128xf32>
    %119 = arith.addf %116, %118 : vector<8x128xf32>
    %120 = arith.negf %119 : vector<8x128xf32>
    %121 = math.exp %120 : vector<8x128xf32>
    %cst_47 = arith.constant 1.000000e+00 : f32
    %122 = vector.broadcast %cst_47 : f32 to vector<8x128xf32>
    %123 = arith.addf %122, %121 : vector<8x128xf32>
    %124 = arith.divf %122, %123 : vector<8x128xf32>
    %125 = math.tanh %119 : vector<8x128xf32>
    %126 = vector.extract_strided_slice %124 {offsets = [0, 0], sizes = [8, 32], strides = [1, 1]} : vector<8x128xf32> to vector<8x32xf32>
    %127 = vector.extract_strided_slice %124 {offsets = [0, 32], sizes = [8, 32], strides = [1, 1]} : vector<8x128xf32> to vector<8x32xf32>
    %128 = vector.extract_strided_slice %125 {offsets = [0, 64], sizes = [8, 32], strides = [1, 1]} : vector<8x128xf32> to vector<8x32xf32>
    %129 = vector.extract_strided_slice %124 {offsets = [0, 96], sizes = [8, 32], strides = [1, 1]} : vector<8x128xf32> to vector<8x32xf32>
    %130 = arith.mulf %127, %106 : vector<8x32xf32>
    %131 = arith.mulf %126, %128 : vector<8x32xf32>
    %132 = arith.addf %130, %131 : vector<8x32xf32>
    %133 = math.tanh %132 : vector<8x32xf32>
    %134 = arith.mulf %129, %133 : vector<8x32xf32>
    %135 = arith.index_cast %c4_i32 : i32 to index
    %c0_48 = arith.constant 0 : index
    %c0_49 = arith.constant 0 : index
    %136 = vector.load %arg6[%135, %c0_48, %c0_49] : memref<8x8x32xf32, #tpu.memory_space<vmem>>, vector<1x8x32xf32>
    %137 = vector.shape_cast %136 : vector<1x8x32xf32> to vector<8x32xf32>
    %138 = vector.shape_cast %134 : vector<8x32xf32> to vector<1x8x32xf32>
    tpu.vector_store %arg6[%135, %c0_48, %c0_49], %138 {strides = array<i32>} : memref<8x8x32xf32, #tpu.memory_space<vmem>>, vector<1x8x32xf32>,
    %c5_i32 = arith.constant 5 : i32
    %c8_i32_50 = arith.constant 8 : i32
    %139 = arith.muli %c5_i32, %c8_i32_50 : i32
    %140 = tpu.assume_multiple %139, 8 : i32
    %141 = arith.index_cast %140 : i32 to index
    %c0_51 = arith.constant 0 : index
    %142 = vector.load %arg9[%141, %c0_51] : memref<64x128xf32, #tpu.memory_space<vmem>>, vector<8x128xf32>
    %c0_52 = arith.constant 0 : index
    %c0_53 = arith.constant 0 : index
    %143 = vector.load %arg5[%c0_52, %c0_53] : memref<32x128xf32, #tpu.memory_space<vmem>>, vector<32x128xf32>
    %cst_54 = arith.constant dense<0.000000e+00> : vector<8x128xf32>
    %144 = tpu.matmul %134, %143, %cst_54 {dimension_numbers = #tpu.dot_dimension_numbers<[1], [0], [0], [1], [0, 0, 1, 1], [], []>} : vector<8x32xf32>, vector<32x128xf32>, vector<8x128xf32> -> vector<8x128xf32>
    %145 = arith.addf %142, %144 : vector<8x128xf32>
    %146 = arith.negf %145 : vector<8x128xf32>
    %147 = math.exp %146 : vector<8x128xf32>
    %cst_55 = arith.constant 1.000000e+00 : f32
    %148 = vector.broadcast %cst_55 : f32 to vector<8x128xf32>
    %149 = arith.addf %148, %147 : vector<8x128xf32>
    %150 = arith.divf %148, %149 : vector<8x128xf32>
    %151 = math.tanh %145 : vector<8x128xf32>
    %152 = vector.extract_strided_slice %150 {offsets = [0, 0], sizes = [8, 32], strides = [1, 1]} : vector<8x128xf32> to vector<8x32xf32>
    %153 = vector.extract_strided_slice %150 {offsets = [0, 32], sizes = [8, 32], strides = [1, 1]} : vector<8x128xf32> to vector<8x32xf32>
    %154 = vector.extract_strided_slice %151 {offsets = [0, 64], sizes = [8, 32], strides = [1, 1]} : vector<8x128xf32> to vector<8x32xf32>
    %155 = vector.extract_strided_slice %150 {offsets = [0, 96], sizes = [8, 32], strides = [1, 1]} : vector<8x128xf32> to vector<8x32xf32>
    %156 = arith.mulf %153, %132 : vector<8x32xf32>
    %157 = arith.mulf %152, %154 : vector<8x32xf32>
    %158 = arith.addf %156, %157 : vector<8x32xf32>
    %159 = math.tanh %158 : vector<8x32xf32>
    %160 = arith.mulf %155, %159 : vector<8x32xf32>
    %161 = arith.index_cast %c5_i32 : i32 to index
    %c0_56 = arith.constant 0 : index
    %c0_57 = arith.constant 0 : index
    %162 = vector.load %arg6[%161, %c0_56, %c0_57] : memref<8x8x32xf32, #tpu.memory_space<vmem>>, vector<1x8x32xf32>
    %163 = vector.shape_cast %162 : vector<1x8x32xf32> to vector<8x32xf32>
    %164 = vector.shape_cast %160 : vector<8x32xf32> to vector<1x8x32xf32>
    tpu.vector_store %arg6[%161, %c0_56, %c0_57], %164 {strides = array<i32>} : memref<8x8x32xf32, #tpu.memory_space<vmem>>, vector<1x8x32xf32>,
    %c6_i32 = arith.constant 6 : i32
    %c8_i32_58 = arith.constant 8 : i32
    %165 = arith.muli %c6_i32, %c8_i32_58 : i32
    %166 = tpu.assume_multiple %165, 8 : i32
    %167 = arith.index_cast %166 : i32 to index
    %c0_59 = arith.constant 0 : index
    %168 = vector.load %arg9[%167, %c0_59] : memref<64x128xf32, #tpu.memory_space<vmem>>, vector<8x128xf32>
    %c0_60 = arith.constant 0 : index
    %c0_61 = arith.constant 0 : index
    %169 = vector.load %arg5[%c0_60, %c0_61] : memref<32x128xf32, #tpu.memory_space<vmem>>, vector<32x128xf32>
    %cst_62 = arith.constant dense<0.000000e+00> : vector<8x128xf32>
    %170 = tpu.matmul %160, %169, %cst_62 {dimension_numbers = #tpu.dot_dimension_numbers<[1], [0], [0], [1], [0, 0, 1, 1], [], []>} : vector<8x32xf32>, vector<32x128xf32>, vector<8x128xf32> -> vector<8x128xf32>
    %171 = arith.addf %168, %170 : vector<8x128xf32>
    %172 = arith.negf %171 : vector<8x128xf32>
    %173 = math.exp %172 : vector<8x128xf32>
    %cst_63 = arith.constant 1.000000e+00 : f32
    %174 = vector.broadcast %cst_63 : f32 to vector<8x128xf32>
    %175 = arith.addf %174, %173 : vector<8x128xf32>
    %176 = arith.divf %174, %175 : vector<8x128xf32>
    %177 = math.tanh %171 : vector<8x128xf32>
    %178 = vector.extract_strided_slice %176 {offsets = [0, 0], sizes = [8, 32], strides = [1, 1]} : vector<8x128xf32> to vector<8x32xf32>
    %179 = vector.extract_strided_slice %176 {offsets = [0, 32], sizes = [8, 32], strides = [1, 1]} : vector<8x128xf32> to vector<8x32xf32>
    %180 = vector.extract_strided_slice %177 {offsets = [0, 64], sizes = [8, 32], strides = [1, 1]} : vector<8x128xf32> to vector<8x32xf32>
    %181 = vector.extract_strided_slice %176 {offsets = [0, 96], sizes = [8, 32], strides = [1, 1]} : vector<8x128xf32> to vector<8x32xf32>
    %182 = arith.mulf %179, %158 : vector<8x32xf32>
    %183 = arith.mulf %178, %180 : vector<8x32xf32>
    %184 = arith.addf %182, %183 : vector<8x32xf32>
    %185 = math.tanh %184 : vector<8x32xf32>
    %186 = arith.mulf %181, %185 : vector<8x32xf32>
    %187 = arith.index_cast %c6_i32 : i32 to index
    %c0_64 = arith.constant 0 : index
    %c0_65 = arith.constant 0 : index
    %188 = vector.load %arg6[%187, %c0_64, %c0_65] : memref<8x8x32xf32, #tpu.memory_space<vmem>>, vector<1x8x32xf32>
    %189 = vector.shape_cast %188 : vector<1x8x32xf32> to vector<8x32xf32>
    %190 = vector.shape_cast %186 : vector<8x32xf32> to vector<1x8x32xf32>
    tpu.vector_store %arg6[%187, %c0_64, %c0_65], %190 {strides = array<i32>} : memref<8x8x32xf32, #tpu.memory_space<vmem>>, vector<1x8x32xf32>,
    %c7_i32 = arith.constant 7 : i32
    %c8_i32_66 = arith.constant 8 : i32
    %191 = arith.muli %c7_i32, %c8_i32_66 : i32
    %192 = tpu.assume_multiple %191, 8 : i32
    %193 = arith.index_cast %192 : i32 to index
    %c0_67 = arith.constant 0 : index
    %194 = vector.load %arg9[%193, %c0_67] : memref<64x128xf32, #tpu.memory_space<vmem>>, vector<8x128xf32>
    %c0_68 = arith.constant 0 : index
    %c0_69 = arith.constant 0 : index
    %195 = vector.load %arg5[%c0_68, %c0_69] : memref<32x128xf32, #tpu.memory_space<vmem>>, vector<32x128xf32>
    %cst_70 = arith.constant dense<0.000000e+00> : vector<8x128xf32>
    %196 = tpu.matmul %186, %195, %cst_70 {dimension_numbers = #tpu.dot_dimension_numbers<[1], [0], [0], [1], [0, 0, 1, 1], [], []>} : vector<8x32xf32>, vector<32x128xf32>, vector<8x128xf32> -> vector<8x128xf32>
    %197 = arith.addf %194, %196 : vector<8x128xf32>
    %198 = arith.negf %197 : vector<8x128xf32>
    %199 = math.exp %198 : vector<8x128xf32>
    %cst_71 = arith.constant 1.000000e+00 : f32
    %200 = vector.broadcast %cst_71 : f32 to vector<8x128xf32>
    %201 = arith.addf %200, %199 : vector<8x128xf32>
    %202 = arith.divf %200, %201 : vector<8x128xf32>
    %203 = math.tanh %197 : vector<8x128xf32>
    %204 = vector.extract_strided_slice %202 {offsets = [0, 0], sizes = [8, 32], strides = [1, 1]} : vector<8x128xf32> to vector<8x32xf32>
    %205 = vector.extract_strided_slice %202 {offsets = [0, 32], sizes = [8, 32], strides = [1, 1]} : vector<8x128xf32> to vector<8x32xf32>
    %206 = vector.extract_strided_slice %203 {offsets = [0, 64], sizes = [8, 32], strides = [1, 1]} : vector<8x128xf32> to vector<8x32xf32>
    %207 = vector.extract_strided_slice %202 {offsets = [0, 96], sizes = [8, 32], strides = [1, 1]} : vector<8x128xf32> to vector<8x32xf32>
    %208 = arith.mulf %205, %184 : vector<8x32xf32>
    %209 = arith.mulf %204, %206 : vector<8x32xf32>
    %210 = arith.addf %208, %209 : vector<8x32xf32>
    %211 = math.tanh %210 : vector<8x32xf32>
    %212 = arith.mulf %207, %211 : vector<8x32xf32>
    %213 = arith.index_cast %c7_i32 : i32 to index
    %c0_72 = arith.constant 0 : index
    %c0_73 = arith.constant 0 : index
    %214 = vector.load %arg6[%213, %c0_72, %c0_73] : memref<8x8x32xf32, #tpu.memory_space<vmem>>, vector<1x8x32xf32>
    %215 = vector.shape_cast %214 : vector<1x8x32xf32> to vector<8x32xf32>
    %216 = vector.shape_cast %212 : vector<8x32xf32> to vector<1x8x32xf32>
    tpu.vector_store %arg6[%213, %c0_72, %c0_73], %216 {strides = array<i32>} : memref<8x8x32xf32, #tpu.memory_space<vmem>>, vector<1x8x32xf32>,
    %c8_i32_74 = arith.constant 8 : i32
    %c0_75 = arith.constant 0 : index
    %c0_76 = arith.constant 0 : index
    %217 = vector.load %arg7[%c0_75, %c0_76] : memref<8x32xf32, #tpu.memory_space<vmem>>, vector<8x32xf32>
    tpu.vector_store %arg7[%c0_75, %c0_76], %212 {strides = array<i32>} : memref<8x32xf32, #tpu.memory_space<vmem>>, vector<8x32xf32>,
    %c0_77 = arith.constant 0 : index
    %c0_78 = arith.constant 0 : index
    %218 = vector.load %arg8[%c0_77, %c0_78] : memref<8x32xf32, #tpu.memory_space<vmem>>, vector<8x32xf32>
    tpu.vector_store %arg8[%c0_77, %c0_78], %210 {strides = array<i32>} : memref<8x32xf32, #tpu.memory_space<vmem>>, vector<8x32xf32>,
    return
  }
  func.func @transform_0(%arg0: i32) -> (i32, i32) {
    %c0_i32 = arith.constant 0 : i32
    %c0_i32_0 = arith.constant 0 : i32
    return %arg0, %c0_i32 : i32, i32
  }
  func.func @transform_1(%arg0: i32) -> (i32, i32) {
    %c0_i32 = arith.constant 0 : i32
    %c0_i32_0 = arith.constant 0 : i32
    %c0_i32_1 = arith.constant 0 : i32
    return %c0_i32, %c0_i32_0 : i32, i32
  }
  func.func @transform_2(%arg0: i32) -> (i32, i32) {
    %c0_i32 = arith.constant 0 : i32
    %c0_i32_0 = arith.constant 0 : i32
    %c0_i32_1 = arith.constant 0 : i32
    return %c0_i32, %c0_i32_0 : i32, i32
  }
  func.func @transform_3(%arg0: i32) -> (i32, i32) {
    %c0_i32 = arith.constant 0 : i32
    %c0_i32_0 = arith.constant 0 : i32
    %c0_i32_1 = arith.constant 0 : i32
    return %c0_i32, %c0_i32_0 : i32, i32
  }
  func.func @transform_4(%arg0: i32) -> (i32, i32) {
    %c0_i32 = arith.constant 0 : i32
    %c0_i32_0 = arith.constant 0 : i32
    %c0_i32_1 = arith.constant 0 : i32
    return %c0_i32, %c0_i32_0 : i32, i32
  }
  func.func @transform_5(%arg0: i32) -> (i32, i32, i32) {
    %c0_i32 = arith.constant 0 : i32
    %c0_i32_0 = arith.constant 0 : i32
    %c0_i32_1 = arith.constant 0 : i32
    return %arg0, %c0_i32, %c0_i32_0 : i32, i32, i32
  }
  func.func @transform_6(%arg0: i32) -> (i32, i32) {
    %c0_i32 = arith.constant 0 : i32
    %c0_i32_0 = arith.constant 0 : i32
    %c0_i32_1 = arith.constant 0 : i32
    return %c0_i32, %c0_i32_0 : i32, i32
  }
  func.func @transform_7(%arg0: i32) -> (i32, i32) {
    %c0_i32 = arith.constant 0 : i32
    %c0_i32_0 = arith.constant 0 : i32
    %c0_i32_1 = arith.constant 0 : i32
    return %c0_i32, %c0_i32_0 : i32, i32
  }
}

</mosaic_0001>

<bundles_post_ra>
// kernel: dncoder_forward.1
= control target key start
LH: loop header
LB: loop body
LE: loop exit
PB: predicated region body
PF: predicated region fallthrough
CT: control target
= control target key end

     0   :  { %v1392_v0 = vmov 0.0|0.0   ;;  %vm43_vm0 = vcmask 138240   ;;  %vm1393_vm1 = vmmov 0   ;;  %v1394_v7 = vmov 0.0   ;;  %s1395_s26 = smov 64   ;;  %s1397_s29 = smov 96   ;;  %s1656_s3 = inlined_call_operand.vmem [shape: f32[17,128], index: 3, kind: input, shape index: {}]   ;;  %s1657_s4 = inlined_call_operand.vmem [shape: f32[32,128], index: 4, kind: input, shape index: {}]   ;;  %s1658_s0 = inlined_call_operand.vmem [shape: f32[64,17], index: 0, kind: input, shape index: {}]   ;;  %s1659_s1 = inlined_call_operand.vmem [shape: f32[8,32], index: 1, kind: input, shape index: {}]   ;;  %s1660_s6 = inlined_call_operand.vmem [shape: f32[8,32], index: 6, kind: output, shape index: {1}]   ;;  %s1661_s2 = inlined_call_operand.vmem [shape: f32[8,32], index: 2, kind: input, shape index: {}]   ;;  %s1662_s7 = inlined_call_operand.vmem [shape: f32[8,32], index: 7, kind: output, shape index: {2}]   ;;  %s1663_s5 = inlined_call_operand.vmem [shape: f32[8,8,32], index: 5, kind: output, shape index: {0}]  }
   0x1   :  { %1274 = vmatprep.subr.bf16.mxu1 %v1392_v0  ;;  %v40_v1 = vld [vmem:[%s1656_s3] sm:$0xff]  ;;  %v41_v2 = vld [vmem:[%s1656_s3 + $0x8] sm:$0xff]  ;;  %v190_v6 = vld [vmem:[%s1657_s4 + $0x10] sm:$0xff]  ;;  %1190 = vmatprep.mubr.msk.f32.mxu1 %vm1393_vm1, %v1394_v7  ;;  %vm28_vm2 = vcmask 261120   ;;  %vm68_vm3 = vcmask 1040384  }
   0x2   :  { %v188_v3 = vld [vmem:[%s1657_s4] sm:$0xff]  ;;  %v1270_v4 = vpack.c.bf16 %v41_v2, %v40_v1  ;;  %v189_v5 = vld [vmem:[%s1657_s4 + $0x8] sm:$0xff]  ;;  %v42_v9 = vld [vmem:[%s1656_s3 + $0x10] sm:$0x1] }
   0x3   :  { %v1456_v8 = vpack.c.bf16 %v189_v5, %v188_v3  ;;  %v191_v10 = vld [vmem:[%s1657_s4 + $0x18] sm:$0xff]  ;;  %v32_v11 = vld [vmem:[%s1658_s0] sm:$0xff]  ;;  %v33_v14 = vld [vmem:[%s1658_s0 + $0x8] sm:$0xff] }
   0x4   :  { %1271 = vmatprep.subr.bf16.mxu0 %v1270_v4  ;;  %1170 = vmatprep.mubr.msk.f32.mxu0 %vm43_vm0, %v32_v11  ;;  %v27_v12 = vld [vmem:[%s1659_s1] sm:$0xff]  ;;  %v1472_v13 = vpack.c.bf16 %v191_v10, %v190_v6  ;;  %v34_v51 = vld [vmem:[%s1658_s0 + $0x10] sm:$0xff]  ;;  %v35_v52 = vld [vmem:[%s1658_s0 + $0x18] sm:$0xff] }
   0x5   :  { %1276 = vmatpush3.bf16.msra.mxu1 %v1456_v8  ;;  %1273 = vmatpush3.bf16.msra.mxu0 %v1270_v4  ;;  %29 = vst.msk [vmem:[%s1660_s6] sm:$0xff] %vm28_vm2, %v27_v12  ;;  %v30_v16 = vld [vmem:[%s1661_s2] sm:$0xff]  ;;  %s1396_s2 = smov 32   ;;  %v37_v54 = vld [vmem:[%s1658_s0 + $0x28] sm:$0xff]  ;;  %v38_v55 = vld [vmem:[%s1658_s0 + $0x30] sm:$0xff] }
   0x6   :  { %1277 = vmatprep.subr.bf16.mxu1 %v1392_v0  ;;  %1168 = vmatprep.subr.msk.mxu0 %vm68_vm3, %v42_v9  ;;  %31 = vst.msk [vmem:[%s1662_s7] sm:$0xff] %vm28_vm2, %v30_v16  ;;  %v36_v53 = vld [vmem:[%s1658_s0 + $0x20] sm:$0xff]  ;;  %v39_v56 = vld [vmem:[%s1658_s0 + $0x38] sm:$0xff] }
   0x9   :  { %1279 = vmatpush3.bf16.msra.mxu1 %v1472_v13  ;;  %1169 = vmatpush3.msk.msra.mxu0 %vm68_vm3, %v42_v9 }
   0xa   :  { %1171 = vmatmul.mubr.msk.f32.vlgmr.msra.gmra.mrb[0].mxu0 %vm43_vm0, %v33_v14  ;;  %1280 = vmatprep.subr.bf16.mxu1 %v1392_v0 }
   0xb   :  { %1286 = vmatprep.subr.bf16.mxu0 %v1392_v0  ;;  %1173 = vmatprep.mubr.msk.f32.mxu0 %vm43_vm0, %v34_v51 }
   0xc   :  { %v185_v15 = vld [vmem:[%s1660_s6] sm:$0xff]  ;;  %1288 = vmatpush3.bf16.msra.mxu0 %v1456_v8 }
   0xd   :  { %1191 = vmatmul.mubr.msk.f32.vlgmr.msra.gmra.mrb[0].mxu1 %vm28_vm2, %v185_v15  ;;  %1289 = vmatprep.subr.bf16.mxu0 %v1392_v0  ;;  %v186_v23 = vld [vmem:[%s1662_s7] sm:$0xff] }
   0xe   :  { %1282 = vmatpush3.bf16.msra.mxu1 %v1456_v8  ;;  %1201 = vmatprep.mubr.msk.f32.mxu1 %vm1393_vm1, %v1394_v7 }
   0xf   :  { %1283 = vmatprep.subr.bf16.mxu1 %v1392_v0  ;;  %1174 = vmatmul.mubr.msk.f32.gmra.mrb[2].mxu0 %vm43_vm0, %v35_v52 }
  0x10   :  { %1291 = vmatpush3.bf16.msra.mxu0 %v1472_v13  ;;  %1176 = vmatprep.mubr.msk.f32.mxu0 %vm43_vm0, %v36_v53 }
  0x11   :  { %1298 = vmatprep.subr.bf16.mxu0 %v1392_v0 }
  0x12   :  { %1285 = vmatpush3.bf16.msra.mxu1 %v1472_v13 }
  0x13   :  { %1292 = vmatprep.subr.bf16.mxu1 %v1392_v0  ;;  %1177 = vmatmul.mubr.msk.f32.gmra.mrb[4].mxu0 %vm43_vm0, %v37_v54 }
  0x14   :  { %1179 = vmatprep.mubr.msk.f32.mxu0 %vm43_vm0, %v38_v55 }
  0x17   :  { %1180 = vmatmul.mubr.msk.f32.gmra.mrb[6].mxu0 %vm43_vm0, %v39_v56 }
  0x18   :  { %1212 = vmatprep.mubr.msk.f32.mxu0 %vm1393_vm1, %v1394_v7 }
  0xdd   :  { %v1172_v17 = vpop.f32.mrb[0].mxu0 }
  0xde   :  { %v138_v18 = vpop.f32.mrb[1].mxu0 }
  0xe0   :  { %v262_v19 = vpop.f32.mrb[0].mxu1 }
  0xe1   :  { %v266_v20 = vadd.f32 %v262_v19, %v138_v18  ;;  %v1192_v21 = vpop.f32.mrb[1].mxu1 }
  0xe2   :  { %v1175_v60 = vpop.f32.mrb[2].mxu0 }
  0xe3   :  { %1328 = vtanh.f32 %v266_v20  ;;  %v1091_v24 = vmul.f32 -1.442695, %v266_v20  ;;  %v148_v61 = vpop.f32.mrb[3].mxu0 }
  0xe5   :  { %1330 = vpow2.f32 %v1091_v24 }
  0xe6   :  { %v1556_v62 = vpop.f32.mrb[4].mxu0 }
  0xe7   :  { %v1558_v63 = vpop.f32.mrb[5].mxu0 }
  0xea   :  { %v1560_v1 = vpop.f32.mrb[6].mxu0 }
  0xeb   :  { %v1562_v2 = vpop.f32.mrb[7].mxu0 }
  0xed   :  { %v1329_v22 = vpop.eup %1328 }
  0xee   :  { %280 = vrot.lane.b32.xlu0 %v1329_v22, %s1395_s26 }
  0xef   :  { %v1331_v25 = vpop.eup %1330 }
  0xf0   :  { %v270_v26 = vadd.f32 1.0, %v1331_v25 }
  0xf2   :  { %275 = vrot.lane.b32.xlu0 %v186_v23, %s1396_s2  ;;  %1332 = vrcp.f32 %v270_v26 }
  0xfc   :  { %v1333_v27 = vpop.eup %1332 }
 0x160   :  { %v281_v28 = vpop.permute.xlu0 %280 }
 0x161   :  { %v283_v29 = vmul.f32 %v1333_v27, %v281_v28 }
 0x163   :  { %285 = vrot.lane.b32.xlu1 %v283_v29, %s1396_s2 }
 0x164   :  { %v276_v30 = vpop.permute.xlu0 %275 }
 0x165   :  { %v278_v31 = vmul.f32 %v1333_v27, %v276_v30 }
 0x1d5   :  { %v286_v32 = vpop.permute.xlu1 %285 }
 0x1d6   :  { %v288_v33 = vadd.f32 %v286_v32, %v278_v31 }
 0x1d8   :  { %1334 = vtanh.f32 %v288_v33 }
 0x1e2   :  { %v1335_v34 = vpop.eup %1334 }
 0x1e3   :  { %291 = vrot.lane.b32.xlu1 %v1335_v34, %s1395_s26 }
 0x255   :  { %v292_v35 = vpop.permute.xlu1 %291 }
 0x256   :  { %v294_v36 = vmul.f32 %v1333_v27, %v292_v35 }
 0x258   :  { %296 = vrot.lane.b32.xlu0 %v294_v36, %s1396_s2 }
 0x2ca   :  { %v297_v37 = vpop.permute.xlu0 %296 }
 0x2cb   :  { %299 = vst.msk [vmem:[%s1663_s5] sm:$0xff] %vm28_vm2, %v297_v37  ;;  %1202 = vmatmul.mubr.msk.f32.vlgmr.msra.gmra.mrb[2].mxu1 %vm28_vm2, %v297_v37 }
 0x2cc   :  { %1294 = vmatpush3.bf16.msra.mxu1 %v1456_v8  ;;  %1223 = vmatprep.mubr.msk.f32.mxu1 %vm1393_vm1, %v1394_v7 }
 0x2cd   :  { %1295 = vmatprep.subr.bf16.mxu1 %v1392_v0 }
 0x2d0   :  { %1297 = vmatpush3.bf16.msra.mxu1 %v1472_v13 }
 0x2d1   :  { %1304 = vmatprep.subr.bf16.mxu1 %v1392_v0 }
 0x39e   :  { %v374_v38 = vpop.f32.mrb[2].mxu1 }
 0x39f   :  { %v378_v39 = vadd.f32 %v1172_v17, %v374_v38  ;;  %v1203_v40 = vpop.f32.mrb[3].mxu1 }
 0x3a1   :  { %1336 = vtanh.f32 %v378_v39  ;;  %v1093_v42 = vmul.f32 -1.442695, %v378_v39 }
 0x3a3   :  { %1338 = vpow2.f32 %v1093_v42 }
 0x3ab   :  { %v1337_v41 = vpop.eup %1336 }
 0x3ac   :  { %388 = vrot.lane.b32.xlu1 %v1337_v41, %s1395_s26 }
 0x3ad   :  { %v1339_v43 = vpop.eup %1338 }
 0x3ae   :  { %v382_v44 = vadd.f32 1.0, %v1339_v43 }
 0x3b0   :  { %1340 = vrcp.f32 %v382_v44 }
 0x3ba   :  { %v1341_v45 = vpop.eup %1340 }
 0x3bb   :  { %v386_v48 = vmul.f32 %v1341_v45, %v288_v33 }
 0x41e   :  { %v389_v46 = vpop.permute.xlu1 %388 }
 0x41f   :  { %v391_v47 = vmul.f32 %v1341_v45, %v389_v46 }
 0x421   :  { %393 = vrot.lane.b32.xlu0 %v391_v47, %s1396_s2 }
 0x493   :  { %v394_v49 = vpop.permute.xlu0 %393 }
 0x494   :  { %v396_v50 = vadd.f32 %v394_v49, %v386_v48 }
 0x496   :  { %1342 = vtanh.f32 %v396_v50 }
 0x4a0   :  { %v1343_v57 = vpop.eup %1342 }
 0x4a1   :  { %399 = vrot.lane.b32.xlu1 %v1343_v57, %s1395_s26 }
 0x513   :  { %v400_v58 = vpop.permute.xlu1 %399 }
 0x514   :  { %v402_v59 = vmul.f32 %v1341_v45, %v400_v58 }
 0x516   :  { %404 = vrot.lane.b32.xlu0 %v402_v59, %s1396_s2 }
 0x588   :  { %v405_v3 = vpop.permute.xlu0 %404 }
 0x589   :  { %1094 = vst.msk [vmem:[%s1663_s5 + $0x8] sm:$0xff] %vm28_vm2, %v405_v3  ;;  %1213 = vmatmul.mubr.msk.f32.vlgmr.msra.gmra.mrb[8].mxu0 %vm28_vm2, %v405_v3 }
 0x58a   :  { %1300 = vmatpush3.bf16.msra.mxu0 %v1456_v8  ;;  %1234 = vmatprep.mubr.msk.f32.mxu0 %vm1393_vm1, %v1394_v7 }
 0x58b   :  { %1301 = vmatprep.subr.bf16.mxu0 %v1392_v0 }
 0x58e   :  { %1303 = vmatpush3.bf16.msra.mxu0 %v1472_v13 }
 0x58f   :  { %1310 = vmatprep.subr.bf16.mxu0 %v1392_v0 }
 0x65c   :  { %v483_v4 = vpop.f32.mrb[8].mxu0 }
 0x65d   :  { %v487_v5 = vadd.f32 %v483_v4, %v148_v61  ;;  %v1214_v6 = vpop.f32.mrb[9].mxu0 }
 0x65f   :  { %1344 = vtanh.f32 %v487_v5  ;;  %v1096_v10 = vmul.f32 -1.442695, %v487_v5 }
 0x661   :  { %1346 = vpow2.f32 %v1096_v10 }
 0x669   :  { %v1345_v9 = vpop.eup %1344 }
 0x66a   :  { %497 = vrot.lane.b32.xlu1 %v1345_v9, %s1395_s26 }
 0x66b   :  { %v1347_v11 = vpop.eup %1346 }
 0x66c   :  { %v491_v12 = vadd.f32 1.0, %v1347_v11 }
 0x66e   :  { %1348 = vrcp.f32 %v491_v12 }
 0x678   :  { %v1349_v14 = vpop.eup %1348 }
 0x679   :  { %v495_v17 = vmul.f32 %v1349_v14, %v396_v50 }
 0x6dc   :  { %v498_v15 = vpop.permute.xlu1 %497 }
 0x6dd   :  { %v500_v16 = vmul.f32 %v1349_v14, %v498_v15 }
 0x6df   :  { %502 = vrot.lane.b32.xlu0 %v500_v16, %s1396_s2 }
 0x751   :  { %v503_v18 = vpop.permute.xlu0 %502 }
 0x752   :  { %v505_v19 = vadd.f32 %v503_v18, %v495_v17 }
 0x754   :  { %1350 = vtanh.f32 %v505_v19 }
 0x75e   :  { %v1351_v20 = vpop.eup %1350 }
 0x75f   :  { %508 = vrot.lane.b32.xlu1 %v1351_v20, %s1395_s26 }
 0x7d1   :  { %v509_v21 = vpop.permute.xlu1 %508 }
 0x7d2   :  { %v511_v22 = vmul.f32 %v1349_v14, %v509_v21 }
 0x7d4   :  { %513 = vrot.lane.b32.xlu0 %v511_v22, %s1396_s2 }
 0x846   :  { %v514_v23 = vpop.permute.xlu0 %513 }
 0x847   :  { %1097 = vst.msk [vmem:[%s1663_s5 + $0x10] sm:$0xff] %vm28_vm2, %v514_v23  ;;  %1224 = vmatmul.mubr.msk.f32.vlgmr.msra.gmra.mrb[4].mxu1 %vm28_vm2, %v514_v23 }
 0x848   :  { %1306 = vmatpush3.bf16.msra.mxu1 %v1456_v8  ;;  %1245 = vmatprep.mubr.msk.f32.mxu1 %vm1393_vm1, %v1394_v7 }
 0x849   :  { %1307 = vmatprep.subr.bf16.mxu1 %v1392_v0 }
 0x84c   :  { %1309 = vmatpush3.bf16.msra.mxu1 %v1472_v13 }
 0x84d   :  { %1316 = vmatprep.subr.bf16.mxu1 %v1392_v0 }
 0x91a   :  { %v592_v24 = vpop.f32.mrb[4].mxu1 }
 0x91b   :  { %v596_v25 = vadd.f32 %v1175_v60, %v592_v24  ;;  %v1225_v26 = vpop.f32.mrb[5].mxu1 }
 0x91d   :  { %1352 = vtanh.f32 %v596_v25  ;;  %v1099_v28 = vmul.f32 -1.442695, %v596_v25 }
 0x91f   :  { %1354 = vpow2.f32 %v1099_v28 }
 0x927   :  { %v1353_v27 = vpop.eup %1352 }
 0x928   :  { %606 = vrot.lane.b32.xlu1 %v1353_v27, %s1395_s26 }
 0x929   :  { %v1355_v29 = vpop.eup %1354 }
 0x92a   :  { %v600_v30 = vadd.f32 1.0, %v1355_v29 }
 0x92c   :  { %1356 = vrcp.f32 %v600_v30 }
 0x936   :  { %v1357_v31 = vpop.eup %1356 }
 0x937   :  { %v604_v34 = vmul.f32 %v1357_v31, %v505_v19 }
 0x99a   :  { %v607_v32 = vpop.permute.xlu1 %606 }
 0x99b   :  { %v609_v33 = vmul.f32 %v1357_v31, %v607_v32 }
 0x99d   :  { %611 = vrot.lane.b32.xlu0 %v609_v33, %s1396_s2 }
 0xa0f   :  { %v612_v35 = vpop.permute.xlu0 %611 }
 0xa10   :  { %v614_v36 = vadd.f32 %v612_v35, %v604_v34 }
 0xa12   :  { %1358 = vtanh.f32 %v614_v36 }
 0xa1c   :  { %v1359_v37 = vpop.eup %1358 }
 0xa1d   :  { %617 = vrot.lane.b32.xlu1 %v1359_v37, %s1395_s26 }
 0xa8f   :  { %v618_v38 = vpop.permute.xlu1 %617 }
 0xa90   :  { %v620_v39 = vmul.f32 %v1357_v31, %v618_v38 }
 0xa92   :  { %622 = vrot.lane.b32.xlu0 %v620_v39, %s1396_s2 }
 0xb04   :  { %v623_v40 = vpop.permute.xlu0 %622 }
 0xb05   :  { %1100 = vst.msk [vmem:[%s1663_s5 + $0x18] sm:$0xff] %vm28_vm2, %v623_v40  ;;  %1235 = vmatmul.mubr.msk.f32.vlgmr.msra.gmra.mrb[10].mxu0 %vm28_vm2, %v623_v40 }
 0xb06   :  { %1312 = vmatpush3.bf16.msra.mxu0 %v1456_v8  ;;  %1256 = vmatprep.mubr.msk.f32.mxu0 %vm1393_vm1, %v1394_v7 }
 0xb07   :  { %1313 = vmatprep.subr.bf16.mxu0 %v1392_v0 }
 0xb0a   :  { %1315 = vmatpush3.bf16.msra.mxu0 %v1472_v13 }
 0xbd8   :  { %v701_v41 = vpop.f32.mrb[10].mxu0 }
 0xbd9   :  { %v705_v42 = vadd.f32 %v701_v41, %v1558_v63  ;;  %v1236_v43 = vpop.f32.mrb[11].mxu0 }
 0xbdb   :  { %1360 = vtanh.f32 %v705_v42  ;;  %v1102_v45 = vmul.f32 -1.442695, %v705_v42 }
 0xbdd   :  { %1362 = vpow2.f32 %v1102_v45 }
 0xbe5   :  { %v1361_v44 = vpop.eup %1360 }
 0xbe6   :  { %715 = vrot.lane.b32.xlu1 %v1361_v44, %s1395_s26 }
 0xbe7   :  { %v1363_v46 = vpop.eup %1362 }
 0xbe8   :  { %v709_v47 = vadd.f32 1.0, %v1363_v46 }
 0xbea   :  { %1364 = vrcp.f32 %v709_v47 }
 0xbf4   :  { %v1365_v48 = vpop.eup %1364 }
 0xbf5   :  { %v713_v51 = vmul.f32 %v1365_v48, %v614_v36 }
 0xc58   :  { %v716_v49 = vpop.permute.xlu1 %715 }
 0xc59   :  { %v718_v50 = vmul.f32 %v1365_v48, %v716_v49 }
 0xc5b   :  { %720 = vrot.lane.b32.xlu0 %v718_v50, %s1396_s2 }
 0xccd   :  { %v721_v52 = vpop.permute.xlu0 %720 }
 0xcce   :  { %v723_v53 = vadd.f32 %v721_v52, %v713_v51 }
 0xcd0   :  { %1366 = vtanh.f32 %v723_v53 }
 0xcda   :  { %v1367_v54 = vpop.eup %1366 }
 0xcdb   :  { %726 = vrot.lane.b32.xlu1 %v1367_v54, %s1395_s26 }
 0xd4d   :  { %v727_v55 = vpop.permute.xlu1 %726 }
 0xd4e   :  { %v729_v56 = vmul.f32 %v1365_v48, %v727_v55 }
 0xd50   :  { %731 = vrot.lane.b32.xlu0 %v729_v56, %s1396_s2 }
 0xdc2   :  { %v732_v57 = vpop.permute.xlu0 %731 }
 0xdc3   :  { %1103 = vst.msk [vmem:[%s1663_s5 + $0x20] sm:$0xff] %vm28_vm2, %v732_v57  ;;  %1246 = vmatmul.mubr.msk.f32.vlgmr.msra.gmra.mrb[6].mxu1 %vm28_vm2, %v732_v57 }
 0xdc4   :  { %1318 = vmatpush3.bf16.msra.mxu1 %v1456_v8  ;;  %1267 = vmatprep.mubr.msk.f32.mxu1 %vm1393_vm1, %v1394_v7 }
 0xdc5   :  { %1319 = vmatprep.subr.bf16.mxu1 %v1392_v0 }
 0xdc8   :  { %1321 = vmatpush3.bf16.msra.mxu1 %v1472_v13 }
 0xe96   :  { %v810_v58 = vpop.f32.mrb[6].mxu1 }
 0xe97   :  { %v814_v59 = vadd.f32 %v1556_v62, %v810_v58  ;;  %v1247_v60 = vpop.f32.mrb[7].mxu1 }
 0xe99   :  { %1368 = vtanh.f32 %v814_v59  ;;  %v1105_v63 = vmul.f32 -1.442695, %v814_v59 }
 0xe9b   :  { %1370 = vpow2.f32 %v1105_v63 }
 0xea3   :  { %v1369_v61 = vpop.eup %1368 }
 0xea4   :  { %824 = vrot.lane.b32.xlu1 %v1369_v61, %s1395_s26 }
 0xea5   :  { %v1371_v3 = vpop.eup %1370 }
 0xea6   :  { %v818_v4 = vadd.f32 1.0, %v1371_v3 }
 0xea8   :  { %1372 = vrcp.f32 %v818_v4 }
 0xeb2   :  { %v1373_v8 = vpop.eup %1372 }
 0xeb3   :  { %v822_v0 = vmul.f32 %v1373_v8, %v723_v53 }
 0xf16   :  { %v825_v5 = vpop.permute.xlu1 %824 }
 0xf17   :  { %v827_v7 = vmul.f32 %v1373_v8, %v825_v5 }
 0xf19   :  { %829 = vrot.lane.b32.xlu0 %v827_v7, %s1396_s2 }
 0xf8b   :  { %v830_v13 = vpop.permute.xlu0 %829 }
 0xf8c   :  { %v832_v6 = vadd.f32 %v830_v13, %v822_v0 }
 0xf8e   :  { %1374 = vtanh.f32 %v832_v6 }
 0xf98   :  { %v1375_v62 = vpop.eup %1374 }
 0xf99   :  { %835 = vrot.lane.b32.xlu1 %v1375_v62, %s1395_s26 }
0x100b   :  { %v836_v9 = vpop.permute.xlu1 %835 }
0x100c   :  { %v838_v10 = vmul.f32 %v1373_v8, %v836_v9 }
0x100e   :  { %840 = vrot.lane.b32.xlu0 %v838_v10, %s1396_s2 }
0x1080   :  { %v841_v11 = vpop.permute.xlu0 %840 }
0x1081   :  { %1106 = vst.msk [vmem:[%s1663_s5 + $0x28] sm:$0xff] %vm28_vm2, %v841_v11  ;;  %1257 = vmatmul.mubr.msk.f32.vlgmr.msra.gmra.mrb[12].mxu0 %vm28_vm2, %v841_v11 }
0x1154   :  { %v919_v12 = vpop.f32.mrb[12].mxu0 }
0x1155   :  { %v923_v14 = vadd.f32 %v919_v12, %v1562_v2  ;;  %v1258_v15 = vpop.f32.mrb[13].mxu0 }
0x1157   :  { %1376 = vtanh.f32 %v923_v14  ;;  %v1108_v17 = vmul.f32 -1.442695, %v923_v14 }
0x1159   :  { %1378 = vpow2.f32 %v1108_v17 }
0x1161   :  { %v1377_v16 = vpop.eup %1376 }
0x1162   :  { %933 = vrot.lane.b32.xlu1 %v1377_v16, %s1395_s26 }
0x1163   :  { %v1379_v18 = vpop.eup %1378 }
0x1164   :  { %v927_v19 = vadd.f32 1.0, %v1379_v18 }
0x1166   :  { %1380 = vrcp.f32 %v927_v19 }
0x1170   :  { %v1381_v20 = vpop.eup %1380 }
0x1171   :  { %v931_v23 = vmul.f32 %v1381_v20, %v832_v6 }
0x11d4   :  { %v934_v21 = vpop.permute.xlu1 %933 }
0x11d5   :  { %v936_v22 = vmul.f32 %v1381_v20, %v934_v21 }
0x11d7   :  { %938 = vrot.lane.b32.xlu0 %v936_v22, %s1396_s2 }
0x1249   :  { %v939_v24 = vpop.permute.xlu0 %938 }
0x124a   :  { %v941_v25 = vadd.f32 %v939_v24, %v931_v23 }
0x124c   :  { %1382 = vtanh.f32 %v941_v25 }
0x1256   :  { %v1383_v2 = vpop.eup %1382 }
0x1257   :  { %944 = vrot.lane.b32.xlu1 %v1383_v2, %s1395_s26 }
0x12c9   :  { %v945_v26 = vpop.permute.xlu1 %944 }
0x12ca   :  { %v947_v27 = vmul.f32 %v1381_v20, %v945_v26 }
0x12cc   :  { %949 = vrot.lane.b32.xlu0 %v947_v27, %s1396_s2 }
0x133e   :  { %v950_v28 = vpop.permute.xlu0 %949 }
0x133f   :  { %1109 = vst.msk [vmem:[%s1663_s5 + $0x30] sm:$0xff] %vm28_vm2, %v950_v28  ;;  %1268 = vmatmul.mubr.msk.f32.vlgmr.msra.gmra.mrb[8].mxu1 %vm28_vm2, %v950_v28 }
0x1412   :  { %v1028_v29 = vpop.f32.mrb[8].mxu1 }
0x1413   :  { %v1032_v30 = vadd.f32 %v1560_v1, %v1028_v29  ;;  %v1269_v31 = vpop.f32.mrb[9].mxu1 }
0x1415   :  { %1384 = vtanh.f32 %v1032_v30  ;;  %v1111_v33 = vmul.f32 -1.442695, %v1032_v30 }
0x1417   :  { %1386 = vpow2.f32 %v1111_v33 }
0x141f   :  { %v1385_v32 = vpop.eup %1384 }
0x1420   :  { %1042 = vrot.lane.b32.xlu1 %v1385_v32, %s1395_s26 }
0x1421   :  { %v1387_v34 = vpop.eup %1386 }
0x1422   :  { %v1036_v35 = vadd.f32 1.0, %v1387_v34 }
0x1424   :  { %1388 = vrcp.f32 %v1036_v35 }
0x142e   :  { %v1389_v36 = vpop.eup %1388 }
0x142f   :  { %v1040_v39 = vmul.f32 %v1389_v36, %v941_v25 }
0x1492   :  { %v1043_v37 = vpop.permute.xlu1 %1042 }
0x1493   :  { %v1045_v38 = vmul.f32 %v1389_v36, %v1043_v37 }
0x1495   :  { %1047 = vrot.lane.b32.xlu0 %v1045_v38, %s1396_s2 }
0x1507   :  { %v1048_v40 = vpop.permute.xlu0 %1047 }
0x1508   :  { %v1050_v41 = vadd.f32 %v1048_v40, %v1040_v39 }
0x150a   :  { %1390 = vtanh.f32 %v1050_v41 }
0x1514   :  { %v1391_v1 = vpop.eup %1390 }
0x1515   :  { %1053 = vrot.lane.b32.xlu1 %v1391_v1, %s1395_s26 }
0x1519   :  { %1065 = vrot.lane.b32.xlu1 %v1050_v41, %s1397_s29 }
0x1587   :  { %v1054_v42 = vpop.permute.xlu1 %1053 }
0x1588   :  { %v1056_v43 = vmul.f32 %v1389_v36, %v1054_v42 }
0x158a   :  { %1058 = vrot.lane.b32.xlu0 %v1056_v43, %s1396_s2 }
0x158b   :  { %v1066_v44 = vpop.permute.xlu1 %1065 }
0x158c   :  { %1068 = vst.msk [vmem:[%s1662_s7] sm:$0xff] %vm28_vm2, %v1066_v44 }
0x15fc   :  { %v1059_v45 = vpop.permute.xlu0 %1058 }
0x15fd   :  { %1112 = vst.msk [vmem:[%s1663_s5 + $0x38] sm:$0xff] %vm28_vm2, %v1059_v45  ;;  %1063 = vst.msk [vmem:[%s1660_s6] sm:$0xff] %vm28_vm2, %v1059_v45 }

</bundles_post_ra>
